<compile_context>
chip_gen: v7x
topology: tpu7x:2x2x1
jax: 0.10.0
libtpu: 0.0.40
codegen_flags: <defaults>
</compile_context>

<pallas_src>
import functools

import jax
import jax.numpy as jnp
from jax import lax
from jax.experimental import pallas as pl
from jax.experimental.pallas import tpu as pltpu


def _round_up(x: int, m: int) -> int:
    return ((x + m - 1) // m) * m


# ---------------------------------------------------------------------------
# Deterministic parameter init.
# rope_like_init() in the reference runs a 10k-step AdamW fit of `base` so that
# (base - base^T) ~= logm(R) of a RoPE-like rotation R.  That log has a closed form
# (block-diagonal 2x2 skew blocks with the RoPE angles), so we use it directly.
# TODO(synk): the AdamW fitting loop itself has no Pallas equivalent; replaced by the
# exact closed-form generator (identical downstream semantics, deterministic).
def rope_like_base(half_dim: int) -> jnp.ndarray:
    d = 2 * half_dim
    angles = jnp.asarray(
        [1.0 / 10000.0 ** (2 * (j // 2) / half_dim) for j in range(half_dim)],
        dtype=jnp.float32,
    )
    log = jnp.zeros((d, d), dtype=jnp.float32)
    idx = 2 * jnp.arange(half_dim)
    log = log.at[idx, idx + 1].set(angles)
    log = log.at[idx + 1, idx].set(-angles)
    return 0.5 * log  # base such that base - base.T == logm(rotation)


# ---------------------------------------------------------------------------
# Kernel 1: matrix-power chains, single invocation, lane-dense vec rows.
#   out row (k * num_chains + h) = vec_rowmajor(P_h ** k),   k = 0..size
# One chain step:  vec(A @ P_h) == vec(A) @ kron(I_D, P_h)  (operator built in wrapper).
# Loop order is k-outer / h-inner so the `num_chains` chains are independent per step.
def _powers_kernel(op_ref, out_ref, *, dim, n_pow, num_chains):
    """op_ref: (num_chains, D*D, D*D); out_ref: (n_pow*num_chains, D*D)."""
    dd = dim * dim
    # vec_rowmajor(I_D): ones at lane positions that are multiples of (D+1). (hoisted)
    lane = lax.broadcasted_iota(jnp.int32, (1, dd), 1)
    eye_row = jnp.where(lane % (dim + 1) == 0, 1.0, 0.0).astype(jnp.float32)

    accs = [eye_row for _ in range(num_chains)]
    for h in range(num_chains):
        out_ref[pl.ds(h, 1), :] = eye_row            # P**0 == I

    # TODO(synk): for large `size`, switch to a doubling scheme (growing (m, D*D) slab
    # multiplied by kron(I, P^m)) to avoid `size` serialized M=1 matmuls per chain.
    for k in range(1, n_pow):                        # size is small & static -> unroll
        accs = [
            jnp.dot(accs[h], op_ref[h], preferred_element_type=jnp.float32)
            for h in range(num_chains)               # independent chains -> overlap
        ]
        for h in range(num_chains):
            out_ref[pl.ds(k * num_chains + h, 1), :] = accs[h]


def compute_power_maps(primitives: jnp.ndarray, size: int) -> jnp.ndarray:
    """primitives: (AH, D, D) f32 -> (size+1, AH, D, D) with [k, h] = P_h ** k."""
    ah, d, _ = primitives.shape
    dd = d * d
    n_pow = size + 1
    prims = primitives.astype(jnp.float32)

    # Deduplicate identical chains: the reference init tiles ONE base matrix over all
    # A*H heads, so computing one chain and broadcasting removes AHx redundant MXU work.
    identical = bool(jnp.all(prims == prims[0:1]))
    chains = prims[:1] if identical else prims
    nc = chains.shape[0]

    eye = jnp.eye(d, dtype=jnp.float32)
    # Row-vector chain-step operator per chain (built once in the wrapper, tiny).
    ops = jax.vmap(lambda p: jnp.kron(eye, p))(chains)          # (nc, D*D, D*D)

    ops_bytes = nc * dd * dd * 4
    out_bytes = n_pow * nc * dd * 4
    vmem_limit = min(max(2 * (ops_bytes + out_bytes) + (8 << 20), 16 << 20), 64 << 20)

    rows = pl.pallas_call(
        functools.partial(_powers_kernel, dim=d, n_pow=n_pow, num_chains=nc),
        out_shape=jax.ShapeDtypeStruct((n_pow * nc, dd), jnp.float32),
        grid_spec=pltpu.PrefetchScalarGridSpec(
            num_scalar_prefetch=0,
            grid=(1,),  # single invocation: no per-power pipeline overhead
            in_specs=[pl.BlockSpec((nc, dd, dd), lambda i: (0, 0, 0))],
            out_specs=pl.BlockSpec((n_pow * nc, dd), lambda i: (0, 0)),
        ),
        compiler_params=pltpu.CompilerParams(
            dimension_semantics=("arbitrary",),
            vmem_limit_bytes=int(vmem_limit),
        ),
    )(ops)

    per_k = rows.reshape(n_pow, nc, d, d)
    if identical:
        per_k = jnp.broadcast_to(per_k, (n_pow, ah, d, d))
    return per_k


# ---------------------------------------------------------------------------
# Kernel 2: fused one-hot MXU row gather from a VMEM-resident bank.
#   bank: (rows_pad, H*D*D)   idx: (N_pad, 1)   out: (N_pad, H*D*D)
def _onehot_gather_kernel(idx_ref, bank_ref, out_ref):
    chunk = out_ref.shape[0]
    rows = bank_ref.shape[0]
    lane_ids = lax.broadcasted_iota(jnp.int32, (chunk, rows), 1)
    onehot = (lane_ids == idx_ref[...]).astype(jnp.float32)      # (chunk, rows)
    gathered = jnp.dot(onehot, bank_ref[...], preferred_element_type=jnp.float32)
    out_ref[...] = gathered.astype(out_ref.dtype)                # unmasked lane-dense


def gather_rows(bank: jnp.ndarray, flat_idx: jnp.ndarray, *, chunk: int = 256) -> jnp.ndarray:
    """bank: (R, W) f32; flat_idx: (N,) int -> (N, W) gathered rows."""
    rows, width = bank.shape
    rows_pad = _round_up(rows, 8)
    if rows_pad != rows:
        bank = jnp.pad(bank, ((0, rows_pad - rows), (0, 0)))

    n = int(flat_idx.shape[0])
    chunk = min(chunk, _round_up(max(n, 1), 8))      # don't over-pad tiny inputs
    n_pad = _round_up(n, chunk)

    # Defensive bounds clamp (PyTorch fancy indexing would raise on OOB; an OOB one-hot
    # here would silently gather zeros, so clamp instead).
    idx = jnp.zeros((n_pad, 1), jnp.int32)
    idx = idx.at[:n, 0].set(jnp.clip(flat_idx.astype(jnp.int32), 0, rows - 1))

    itemsize = bank.dtype.itemsize
    bank_bytes = rows_pad * width * itemsize
    out_block_bytes = chunk * width * itemsize
    idx_block_bytes = chunk * 4
    vmem_limit = min(
        max(2 * (bank_bytes + out_block_bytes + idx_block_bytes) + (8 << 20), 16 << 20),
        64 << 20,
    )
    # TODO(synk): for banks approaching v7x's 64 MiB/TC VMEM (each TensorCore keeps its
    # own resident copy under "parallel"), use pl.Buffered(1) on the bank spec or fall
    # back to a streamed data-dependent BlockSpec gather instead of a resident bank.

    out = pl.pallas_call(
        _onehot_gather_kernel,
        out_shape=jax.ShapeDtypeStruct((n_pad, width), bank.dtype),
        grid_spec=pltpu.PrefetchScalarGridSpec(
            num_scalar_prefetch=0,
            grid=(n_pad // chunk,),
            in_specs=[
                pl.BlockSpec((chunk, 1), lambda g: (g, 0)),          # indices (VMEM)
                # bank block index is constant -> fetched once, stays resident
                pl.BlockSpec((rows_pad, width), lambda g: (0, 0)),
            ],
            out_specs=pl.BlockSpec((chunk, width), lambda g: (g, 0)),
        ),
        # disjoint output rows per step -> safe to shard across v7x's 2 TensorCores
        compiler_params=pltpu.CompilerParams(
            dimension_semantics=("parallel",),
            vmem_limit_bytes=int(vmem_limit),
        ),
    )(idx, bank)
    return out[:n]


# ---------------------------------------------------------------------------
# Grid module (JAX/Pallas port)
class Grid:
    def __init__(self, num_axes: int, dim: int, num_heads: int) -> None:
        self.dim = dim
        self.num_heads = num_heads
        self.num_axes = num_axes
        base = rope_like_base(dim // 2)  # (dim, dim), matches rope_like_init(dim//2)
        self._primitives = jnp.tile(base[None], (num_axes * num_heads, 1, 1))
        self.maps = None          # (size+1, A, H, D, D), reference layout
        self._bank = None         # (A*(size+1), H*D*D), lane-dense gather bank
        self._n_pow = None

    @property
    def hermitian(self) -> jnp.ndarray:
        return self._primitives - jnp.swapaxes(self._primitives, -1, -2)

    @property
    def primitives(self) -> jnp.ndarray:
        return jax.vmap(jax.scipy.linalg.expm)(self.hermitian)

    def precompute(self, size: int) -> None:
        a, h, d = self.num_axes, self.num_heads, self.dim
        n_pow = size + 1
        per_k = compute_power_maps(self.primitives, size)      # (size+1, A*H, D, D)
        # reference layout, same as the PyTorch module's self.maps
        self.maps = per_k.reshape(n_pow, a, h, d, d)
        # lane-dense gather bank: row (axis*(size+1) + k) = maps[k, axis] flattened
        self._bank = jnp.transpose(self.maps, (1, 0, 2, 3, 4)).reshape(
            a * n_pow, h * d * d
        )
        self._n_pow = n_pow

    def forward(self, xs: jnp.ndarray, ys: jnp.ndarray):
        # PyTorch: maps.chunk(2, dim=1).squeeze(1) -> requires num_axes == 2
        assert self.num_axes == 2, "Grid.forward assumes num_axes == 2 (like the reference)"
        h, d = self.num_heads, self.dim
        n_pow = self._n_pow
        nx, ny = xs.size, ys.size
        # fuse both gathers into one kernel call (axis offset baked into the row index)
        flat = jnp.concatenate([
            xs.reshape(-1).astype(jnp.int32),              # axis 0 rows
            ys.reshape(-1).astype(jnp.int32) + n_pow,      # axis 1 rows
        ])
        rows = gather_rows(self._bank, flat)               # (nx+ny, H*D*D)
        out_x = rows[:nx].reshape(*xs.shape, h, d, d)
        out_y = rows[nx:nx + ny].reshape(*ys.shape, h, d, d)
        return out_x, out_y


# ---------------------------------------------------------------------------
if __name__ == "__main__":
    num_axes, num_heads, dim = 2, 2, 16
    size, B, S = 8, 2, 8

    grid = Grid(num_axes=num_axes, dim=dim, num_heads=num_heads)
    grid.precompute(size)

    key = jax.random.PRNGKey(0)
    kx, ky = jax.random.split(key)
    xs = jax.random.randint(kx, (B, S), 0, size + 1, dtype=jnp.int32)
    ys = jax.random.randint(ky, (B, S), 0, size + 1, dtype=jnp.int32)

    out_x, out_y = grid.forward(xs, ys)
    jax.block_until_ready((out_x, out_y))

    # pure-JAX reference check (powers + fancy-index gather)
    prims = grid.primitives
    ref = [jnp.tile(jnp.eye(dim, dtype=jnp.float32)[None], (num_axes * num_heads, 1, 1))]
    for _ in range(size):
        ref.append(jnp.einsum("bij,bjk->bik", ref[-1], prims))
    ref_maps = jnp.stack(ref).reshape(size + 1, num_axes, num_heads, dim, dim)
    ref_x = ref_maps[:, 0][xs]
    ref_y = ref_maps[:, 1][ys]

    assert grid.maps.shape == (size + 1, num_axes, num_heads, dim, dim)
    assert out_x.shape == (B, S, num_heads, dim, dim)
    assert out_y.shape == (B, S, num_heads, dim, dim)
    assert jnp.allclose(grid.maps, ref_maps, atol=1e-4), float(
        jnp.abs(grid.maps - ref_maps).max()
    )
    assert jnp.allclose(out_x, ref_x, atol=1e-4), float(jnp.abs(out_x - ref_x).max())
    assert jnp.allclose(out_y, ref_y, atol=1e-4), float(jnp.abs(out_y - ref_y).max())

    print("KERNEL_OK")
</pallas_src>

<mosaic_0001>
module attributes {stable_mosaic.version = 11 : i64} {
  func.func @_powers_kernel(%arg0: i32, %arg1: memref<1x256x256xf32, #tpu.memory_space<vmem>>, %arg2: memref<9x256xf32, #tpu.memory_space<vmem>>) attributes {dimension_semantics = [#tpu.dimension_semantics<arbitrary>], iteration_bounds = array<i64: 1>, scalar_prefetch = 0 : i64, scratch_operands = 0 : i64, tpu.core_type = #tpu.core_type<tc>, window_params = [{pipeline_mode = #tpu.pipeline_mode<synchronous>, transform_indices = @transform_0, window_bounds = array<i64: 1, 256, 256>}, {pipeline_mode = #tpu.pipeline_mode<synchronous>, transform_indices = @transform_1, window_bounds = array<i64: 9, 256>}]} {
    %0 = tpu.iota {dimensions = array<i32: 1>} : vector<1x256xi32>
    %c17_i32 = arith.constant 17 : i32
    %c0_i32 = arith.constant 0 : i32
    %1 = arith.cmpi eq, %c17_i32, %c0_i32 : i32
    %c1_i32 = arith.constant 1 : i32
    %2 = arith.select %1, %c1_i32, %c17_i32 : i32
    %3 = vector.broadcast %2 : i32 to vector<1x256xi32>
    %4 = arith.remsi %0, %3 : vector<1x256xi32>
    %c0_i32_0 = arith.constant 0 : i32
    %5 = vector.broadcast %c0_i32_0 : i32 to vector<1x256xi32>
    %6 = arith.cmpi ne, %4, %5 : vector<1x256xi32>
    %c0_i32_1 = arith.constant 0 : i32
    %7 = vector.broadcast %c0_i32_1 : i32 to vector<1x256xi32>
    %8 = arith.cmpi slt, %4, %7 : vector<1x256xi32>
    %c0_i32_2 = arith.constant 0 : i32
    %9 = arith.cmpi slt, %2, %c0_i32_2 : i32
    %10 = vector.broadcast %9 : i1 to vector<1x256xi1>
    %11 = vector.broadcast %10 : vector<1x256xi1> to vector<1x256xi1>
    %12 = arith.xori %8, %11 : vector<1x256xi1>
    %13 = arith.andi %12, %6 : vector<1x256xi1>
    %14 = vector.broadcast %2 : i32 to vector<1x256xi32>
    %15 = arith.addi %4, %14 : vector<1x256xi32>
    %16 = arith.select %13, %15, %4 : vector<1x256xi1>, vector<1x256xi32>
    %c0_i32_3 = arith.constant 0 : i32
    %17 = vector.broadcast %c0_i32_3 : i32 to vector<1x256xi32>
    %18 = arith.cmpi eq, %16, %17 : vector<1x256xi32>
    %cst = arith.constant 1.000000e+00 : f32
    %cst_4 = arith.constant 0.000000e+00 : f32
    %19 = vector.broadcast %cst : f32 to vector<1x256xf32>
    %20 = vector.broadcast %cst_4 : f32 to vector<1x256xf32>
    %21 = arith.select %18, %19, %20 : vector<1x256xi1>, vector<1x256xf32>
    %c0 = arith.constant 0 : index
    %c0_5 = arith.constant 0 : index
    %22 = vector.load %arg2[%c0, %c0_5] : memref<9x256xf32, #tpu.memory_space<vmem>>, vector<1x256xf32>
    tpu.vector_store %arg2[%c0, %c0_5], %21 {strides = array<i32>} : memref<9x256xf32, #tpu.memory_space<vmem>>, vector<1x256xf32>,
    %c0_6 = arith.constant 0 : index
    %c0_7 = arith.constant 0 : index
    %c0_8 = arith.constant 0 : index
    %23 = vector.load %arg1[%c0_6, %c0_7, %c0_8] : memref<1x256x256xf32, #tpu.memory_space<vmem>>, vector<1x256x256xf32>
    %24 = vector.shape_cast %23 : vector<1x256x256xf32> to vector<256x256xf32>
    %cst_9 = arith.constant dense<0.000000e+00> : vector<1x256xf32>
    %25 = tpu.matmul %21, %24, %cst_9 {dimension_numbers = #tpu.dot_dimension_numbers<[1], [0], [0], [1], [0, 0, 1, 1], [], []>} : vector<1x256xf32>, vector<256x256xf32>, vector<1x256xf32> -> vector<1x256xf32>
    %c1 = arith.constant 1 : index
    %c0_10 = arith.constant 0 : index
    %26 = vector.load %arg2[%c1, %c0_10] : memref<9x256xf32, #tpu.memory_space<vmem>>, vector<1x256xf32>
    tpu.vector_store %arg2[%c1, %c0_10], %25 {strides = array<i32>} : memref<9x256xf32, #tpu.memory_space<vmem>>, vector<1x256xf32>,
    %c0_11 = arith.constant 0 : index
    %c0_12 = arith.constant 0 : index
    %c0_13 = arith.constant 0 : index
    %27 = vector.load %arg1[%c0_11, %c0_12, %c0_13] : memref<1x256x256xf32, #tpu.memory_space<vmem>>, vector<1x256x256xf32>
    %28 = vector.shape_cast %27 : vector<1x256x256xf32> to vector<256x256xf32>
    %cst_14 = arith.constant dense<0.000000e+00> : vector<1x256xf32>
    %29 = tpu.matmul %25, %28, %cst_14 {dimension_numbers = #tpu.dot_dimension_numbers<[1], [0], [0], [1], [0, 0, 1, 1], [], []>} : vector<1x256xf32>, vector<256x256xf32>, vector<1x256xf32> -> vector<1x256xf32>
    %c2 = arith.constant 2 : index
    %c0_15 = arith.constant 0 : index
    %30 = vector.load %arg2[%c2, %c0_15] : memref<9x256xf32, #tpu.memory_space<vmem>>, vector<1x256xf32>
    tpu.vector_store %arg2[%c2, %c0_15], %29 {strides = array<i32>} : memref<9x256xf32, #tpu.memory_space<vmem>>, vector<1x256xf32>,
    %c0_16 = arith.constant 0 : index
    %c0_17 = arith.constant 0 : index
    %c0_18 = arith.constant 0 : index
    %31 = vector.load %arg1[%c0_16, %c0_17, %c0_18] : memref<1x256x256xf32, #tpu.memory_space<vmem>>, vector<1x256x256xf32>
    %32 = vector.shape_cast %31 : vector<1x256x256xf32> to vector<256x256xf32>
    %cst_19 = arith.constant dense<0.000000e+00> : vector<1x256xf32>
    %33 = tpu.matmul %29, %32, %cst_19 {dimension_numbers = #tpu.dot_dimension_numbers<[1], [0], [0], [1], [0, 0, 1, 1], [], []>} : vector<1x256xf32>, vector<256x256xf32>, vector<1x256xf32> -> vector<1x256xf32>
    %c3 = arith.constant 3 : index
    %c0_20 = arith.constant 0 : index
    %34 = vector.load %arg2[%c3, %c0_20] : memref<9x256xf32, #tpu.memory_space<vmem>>, vector<1x256xf32>
    tpu.vector_store %arg2[%c3, %c0_20], %33 {strides = array<i32>} : memref<9x256xf32, #tpu.memory_space<vmem>>, vector<1x256xf32>,
    %c0_21 = arith.constant 0 : index
    %c0_22 = arith.constant 0 : index
    %c0_23 = arith.constant 0 : index
    %35 = vector.load %arg1[%c0_21, %c0_22, %c0_23] : memref<1x256x256xf32, #tpu.memory_space<vmem>>, vector<1x256x256xf32>
    %36 = vector.shape_cast %35 : vector<1x256x256xf32> to vector<256x256xf32>
    %cst_24 = arith.constant dense<0.000000e+00> : vector<1x256xf32>
    %37 = tpu.matmul %33, %36, %cst_24 {dimension_numbers = #tpu.dot_dimension_numbers<[1], [0], [0], [1], [0, 0, 1, 1], [], []>} : vector<1x256xf32>, vector<256x256xf32>, vector<1x256xf32> -> vector<1x256xf32>
    %c4 = arith.constant 4 : index
    %c0_25 = arith.constant 0 : index
    %38 = vector.load %arg2[%c4, %c0_25] : memref<9x256xf32, #tpu.memory_space<vmem>>, vector<1x256xf32>
    tpu.vector_store %arg2[%c4, %c0_25], %37 {strides = array<i32>} : memref<9x256xf32, #tpu.memory_space<vmem>>, vector<1x256xf32>,
    %c0_26 = arith.constant 0 : index
    %c0_27 = arith.constant 0 : index
    %c0_28 = arith.constant 0 : index
    %39 = vector.load %arg1[%c0_26, %c0_27, %c0_28] : memref<1x256x256xf32, #tpu.memory_space<vmem>>, vector<1x256x256xf32>
    %40 = vector.shape_cast %39 : vector<1x256x256xf32> to vector<256x256xf32>
    %cst_29 = arith.constant dense<0.000000e+00> : vector<1x256xf32>
    %41 = tpu.matmul %37, %40, %cst_29 {dimension_numbers = #tpu.dot_dimension_numbers<[1], [0], [0], [1], [0, 0, 1, 1], [], []>} : vector<1x256xf32>, vector<256x256xf32>, vector<1x256xf32> -> vector<1x256xf32>
    %c5 = arith.constant 5 : index
    %c0_30 = arith.constant 0 : index
    %42 = vector.load %arg2[%c5, %c0_30] : memref<9x256xf32, #tpu.memory_space<vmem>>, vector<1x256xf32>
    tpu.vector_store %arg2[%c5, %c0_30], %41 {strides = array<i32>} : memref<9x256xf32, #tpu.memory_space<vmem>>, vector<1x256xf32>,
    %c0_31 = arith.constant 0 : index
    %c0_32 = arith.constant 0 : index
    %c0_33 = arith.constant 0 : index
    %43 = vector.load %arg1[%c0_31, %c0_32, %c0_33] : memref<1x256x256xf32, #tpu.memory_space<vmem>>, vector<1x256x256xf32>
    %44 = vector.shape_cast %43 : vector<1x256x256xf32> to vector<256x256xf32>
    %cst_34 = arith.constant dense<0.000000e+00> : vector<1x256xf32>
    %45 = tpu.matmul %41, %44, %cst_34 {dimension_numbers = #tpu.dot_dimension_numbers<[1], [0], [0], [1], [0, 0, 1, 1], [], []>} : vector<1x256xf32>, vector<256x256xf32>, vector<1x256xf32> -> vector<1x256xf32>
    %c6 = arith.constant 6 : index
    %c0_35 = arith.constant 0 : index
    %46 = vector.load %arg2[%c6, %c0_35] : memref<9x256xf32, #tpu.memory_space<vmem>>, vector<1x256xf32>
    tpu.vector_store %arg2[%c6, %c0_35], %45 {strides = array<i32>} : memref<9x256xf32, #tpu.memory_space<vmem>>, vector<1x256xf32>,
    %c0_36 = arith.constant 0 : index
    %c0_37 = arith.constant 0 : index
    %c0_38 = arith.constant 0 : index
    %47 = vector.load %arg1[%c0_36, %c0_37, %c0_38] : memref<1x256x256xf32, #tpu.memory_space<vmem>>, vector<1x256x256xf32>
    %48 = vector.shape_cast %47 : vector<1x256x256xf32> to vector<256x256xf32>
    %cst_39 = arith.constant dense<0.000000e+00> : vector<1x256xf32>
    %49 = tpu.matmul %45, %48, %cst_39 {dimension_numbers = #tpu.dot_dimension_numbers<[1], [0], [0], [1], [0, 0, 1, 1], [], []>} : vector<1x256xf32>, vector<256x256xf32>, vector<1x256xf32> -> vector<1x256xf32>
    %c7 = arith.constant 7 : index
    %c0_40 = arith.constant 0 : index
    %50 = vector.load %arg2[%c7, %c0_40] : memref<9x256xf32, #tpu.memory_space<vmem>>, vector<1x256xf32>
    tpu.vector_store %arg2[%c7, %c0_40], %49 {strides = array<i32>} : memref<9x256xf32, #tpu.memory_space<vmem>>, vector<1x256xf32>,
    %c0_41 = arith.constant 0 : index
    %c0_42 = arith.constant 0 : index
    %c0_43 = arith.constant 0 : index
    %51 = vector.load %arg1[%c0_41, %c0_42, %c0_43] : memref<1x256x256xf32, #tpu.memory_space<vmem>>, vector<1x256x256xf32>
    %52 = vector.shape_cast %51 : vector<1x256x256xf32> to vector<256x256xf32>
    %cst_44 = arith.constant dense<0.000000e+00> : vector<1x256xf32>
    %53 = tpu.matmul %49, %52, %cst_44 {dimension_numbers = #tpu.dot_dimension_numbers<[1], [0], [0], [1], [0, 0, 1, 1], [], []>} : vector<1x256xf32>, vector<256x256xf32>, vector<1x256xf32> -> vector<1x256xf32>
    %c8 = arith.constant 8 : index
    %c0_45 = arith.constant 0 : index
    %54 = vector.load %arg2[%c8, %c0_45] : memref<9x256xf32, #tpu.memory_space<vmem>>, vector<1x256xf32>
    tpu.vector_store %arg2[%c8, %c0_45], %53 {strides = array<i32>} : memref<9x256xf32, #tpu.memory_space<vmem>>, vector<1x256xf32>,
    return
  }
  func.func @transform_0(%arg0: i32) -> (i32, i32, i32) {
    %c0_i32 = arith.constant 0 : i32
    %c0_i32_0 = arith.constant 0 : i32
    %c0_i32_1 = arith.constant 0 : i32
    %c0_i32_2 = arith.constant 0 : i32
    return %c0_i32, %c0_i32_0, %c0_i32_1 : i32, i32, i32
  }
  func.func @transform_1(%arg0: i32) -> (i32, i32) {
    %c0_i32 = arith.constant 0 : i32
    %c0_i32_0 = arith.constant 0 : i32
    %c0_i32_1 = arith.constant 0 : i32
    return %c0_i32, %c0_i32_0 : i32, i32
  }
}

</mosaic_0001>

<bundles_post_ra>
// kernel: tpu_custom_call.1
= control target key start
LH: loop header
LB: loop body
LE: loop exit
PB: predicated region body
PF: predicated region fallthrough
CT: control target
= control target key end

     0   :  { %6 = vsyncpa [#allocation3], 0  ;;  %s2419_s0 = inlined_call_operand.hbm [shape: f32[1,256,256], index: 0, kind: input, shape index: {}]   ;;  %s2420_s1 = inlined_call_operand.hbm [shape: f32[9,256], index: 1, kind: output, shape index: {}]  }
   0x1   :  { %7 = vsyncpa [#allocation4], 0  ;;  %s1924_s6 = smov [#allocation2]   ;;  %s1876_s10 = scalar_lea.hbm %s2419_s0, 8192 }
   0x2   :  { %s13_s7 = sshll.u32 %s1924_s6, 4  ;;  %p1877_p0 = scmp.ne.s32.totalorder %s2419_s0, %s1876_s10  ;;  %s14_s7 = int_to_ptr.vmem [resolvable:$true] %s13_s7 }
   0x3   :  { %p1880_p1 = scmp.lt.u32.totalorder %s1876_s10, %s2419_s0 }
   0x5   :  { %p1882_p2 = pnand %p1880_p1, %p1877_p0 }
   0x7   :  { %1885 = shalt.err (!%p1882_p2)
}
   0x8   :  { %s1886_s15 = scalar_lea.vmem %s14_s7, 8192  ;;  %p1891_p4 = scmp.lt.s32.totalorder %s14_s7, %s14_s7 }
   0x9   :  { %p1887_p3 = scmp.ne.s32.totalorder %s14_s7, %s1886_s15  ;;  %p1892_p5 = scmp.lt.s32.totalorder %s1886_s15, %s1886_s15 }
   0xb   :  { %p1893_p6 = por %p1892_p5, %p1891_p4 }
   0xd   :  { %p1894_p7 = pnand %p1893_p6, %p1887_p3 }
   0xf   :  { %1897 = shalt.err (!%p1894_p7)
}
  0x10   :  { %s1925_s16 = smov 256   ;;  %s1926_s17 = smov 16  }
  0x11   :  { %19 = dma.hbm_to_vmem [thread:$0]  %s2419_s0, 8192, %s14_s7, [#allocation3], %s1925_s16, %s1925_s16, %s1926_s17  }
  0x12   :  { %1920 = dma.done.wait [#allocation3], 8192  }
  0x13   :  { %1921 = vsyncadd [#allocation3], 4294959104  ;;  %v23_v0 = vlaneseq  ;;  %v87_v7 = vld [vmem:[#allocation2 + $0x8] sm:$0xff]  ;;  %v89_v8 = vld [vmem:[#allocation2 + $0x18] sm:$0xff]  ;;  %v1927_v51 = vmov 1966171168  }
  0x14   :  { %v86_v9 = vld [vmem:[#allocation2] sm:$0xff]  ;;  %v1963_v10 = vpack.c.bf16 %v89_v8, %v87_v7  ;;  %v88_v11 = vld [vmem:[#allocation2 + $0x10] sm:$0xff]  ;;  %v91_v12 = vld [vmem:[#allocation2 + $0x28] sm:$0xff]  ;;  %v66_v52 = vunpack.c.l.s4 %v1927_v51  ;;  %s1930_s0 = smov [#allocation5]  }
  0x15   :  { %v24_v1 = vand.u32 127, %v23_v0  ;;  %v93_v13 = vld [vmem:[#allocation2 + $0x38] sm:$0xff]  ;;  %v1965_v14 = vpack.c.bf16 %v88_v11, %v86_v9  ;;  %v90_v16 = vld [vmem:[#allocation2 + $0x20] sm:$0xff]  ;;  %v92_v17 = vld [vmem:[#allocation2 + $0x30] sm:$0xff]  ;;  %v69_v62 = vshrl.u32 %v23_v0, 7  ;;  %v1929_v9 = vmov 1.0  }
  0x16   :  { %v1967_v15 = vpack.c.bf16 %v93_v13, %v91_v12  ;;  %v95_v18 = vld [vmem:[#allocation2 + $0x48] sm:$0xff]  ;;  %1354 = vmatprep.subr.bf16.mxu0 %v1963_v10  ;;  %v97_v19 = vld [vmem:[#allocation2 + $0x58] sm:$0xff]  ;;  %1418 = vmatprep.subr.bf16.mxu1 %v1963_v10  ;;  %v1972_v20 = vpack.c.bf16 %v92_v17, %v90_v16  ;;  %v94_v22 = vld [vmem:[#allocation2 + $0x40] sm:$0xff]  ;;  %v67_v61 = vunpack.c.0.s8 %v66_v52  ;;  %vm2043_vm8 = vcmp.lt.s32.totalorder %v23_v0, 256  ;;  %s1339_s20 = sshll.u32 %s1930_s0, 4  ;;  %s1340_s20 = int_to_ptr.vmem [resolvable:$true] %s1339_s20 }
  0x17   :  { %v25_v2 = vadd.s32 128, %v24_v1  ;;  %v1957_v3 = vmul.u32.u64.low 4042322161, %v24_v1  ;;  %v1958_v4 = vmul.u32.u64.high 4042322161, %v24_v1, %v1957_v3  ;;  %1356 = vmatpush1.bf16.msra.mxu0 %v1965_v14  ;;  %1420 = vmatpush1.bf16.msra.mxu1 %v1965_v14  ;;  %v1976_v21 = vpack.c.bf16 %v97_v19, %v95_v18  ;;  %v96_v23 = vld [vmem:[#allocation2 + $0x50] sm:$0xff]  ;;  %v99_v24 = vld [vmem:[#allocation2 + $0x68] sm:$0xff]  ;;  %v101_v25 = vld [vmem:[#allocation2 + $0x78] sm:$0xff]  ;;  %p1903_p9 = scmp.lt.s32.totalorder %s1340_s20, %s1340_s20 }
  0x18   :  { %1358 = vmatprep.subr.bf16.mxu0 %v1967_v15  ;;  %1422 = vmatprep.subr.bf16.mxu1 %v1967_v15  ;;  %v1982_v28 = vpack.c.bf16 %v96_v23, %v94_v22  ;;  %v1986_v29 = vpack.c.bf16 %v101_v25, %v99_v24  ;;  %v98_v30 = vld [vmem:[#allocation2 + $0x60] sm:$0xff]  ;;  %v100_v31 = vld [vmem:[#allocation2 + $0x70] sm:$0xff]  ;;  %v103_v32 = vld [vmem:[#allocation2 + $0x88] sm:$0xff]  ;;  %v1928_v3 = vmov 0.0   ;;  %v2029_v16 = vsub.s32 %v67_v61, %v69_v62  ;;  %s1898_s21 = scalar_lea.vmem %s1340_s20, 512 }
  0x19   :  { %v1960_v5 = vmul.u32.u64.low 4042322161, %v25_v2  ;;  %v1961_v6 = vmul.u32.u64.high 4042322161, %v25_v2, %v1960_v5  ;;  %v32_v26 = vshrl.u32 %v1958_v4, 4  ;;  %v105_v33 = vld [vmem:[#allocation2 + $0x98] sm:$0xff]  ;;  %v1990_v36 = vpack.c.bf16 %v100_v31, %v98_v30  ;;  %v102_v38 = vld [vmem:[#allocation2 + $0x80] sm:$0xff]  ;;  %v104_v39 = vld [vmem:[#allocation2 + $0x90] sm:$0xff]  ;;  %p1899_p8 = scmp.ne.s32.totalorder %s1340_s20, %s1898_s21  ;;  %p1904_p10 = scmp.lt.s32.totalorder %s1898_s21, %s1898_s21 }
  0x1a   :  { %v1994_v37 = vpack.c.bf16 %v105_v33, %v103_v32  ;;  %v107_v40 = vld [vmem:[#allocation2 + $0xa8] sm:$0xff]  ;;  %v109_v41 = vld [vmem:[#allocation2 + $0xb8] sm:$0xff]  ;;  %v1998_v44 = vpack.c.bf16 %v104_v39, %v102_v38  ;;  %v106_v46 = vld [vmem:[#allocation2 + $0xa0] sm:$0xff] }
  0x1b   :  { %v43_v27 = vshrl.u32 %v1961_v6, 4  ;;  %1360 = vmatpush1.bf16.msra.mxu0 %v1972_v20  ;;  %1424 = vmatpush1.bf16.msra.mxu1 %v1972_v20  ;;  %v33_v34 = vmul.u32 17, %v32_v26  ;;  %v2002_v45 = vpack.c.bf16 %v109_v41, %v107_v40  ;;  %v108_v47 = vld [vmem:[#allocation2 + $0xb0] sm:$0xff]  ;;  %v111_v48 = vld [vmem:[#allocation2 + $0xc8] sm:$0xff]  ;;  %v113_v49 = vld [vmem:[#allocation2 + $0xd8] sm:$0xff]  ;;  %p1905_p11 = por %p1904_p10, %p1903_p9 }
  0x1c   :  { %1362 = vmatprep.subr.bf16.mxu0 %v1976_v21  ;;  %1426 = vmatprep.subr.bf16.mxu1 %v1976_v21  ;;  %v2006_v54 = vpack.c.bf16 %v108_v47, %v106_v46  ;;  %v2010_v55 = vpack.c.bf16 %v113_v49, %v111_v48  ;;  %v110_v56 = vld [vmem:[#allocation2 + $0xc0] sm:$0xff]  ;;  %v112_v57 = vld [vmem:[#allocation2 + $0xd0] sm:$0xff]  ;;  %v115_v58 = vld [vmem:[#allocation2 + $0xe8] sm:$0xff] }
  0x1d   :  { %v44_v35 = vmul.u32 17, %v43_v27  ;;  %v34_v42 = vsub.s32 %v24_v1, %v33_v34  ;;  %v117_v59 = vld [vmem:[#allocation2 + $0xf8] sm:$0xff]  ;;  %v114_v6 = vld [vmem:[#allocation2 + $0xe0] sm:$0xff]  ;;  %v116_v7 = vld [vmem:[#allocation2 + $0xf0] sm:$0xff]  ;;  %p1906_p12 = pnand %p1905_p11, %p1899_p8 }
  0x1e   :  { %v2026_v5 = vpack.c.bf16 %v117_v59, %v115_v58  ;;  %v119_v11 = vld [vmem:[#allocation2 + $0x108] sm:$0xff]  ;;  %v121_v12 = vld [vmem:[#allocation2 + $0x118] sm:$0xff]  ;;  %v2033_v17 = vpack.c.bf16 %v116_v7, %v114_v6  ;;  %v118_v22 = vld [vmem:[#allocation2 + $0x100] sm:$0xff] }
  0x1f   :  { %1364 = vmatpush1.bf16.msra.mxu0 %v1982_v28  ;;  %1428 = vmatpush1.bf16.msra.mxu1 %v1982_v28  ;;  %v45_v43 = vsub.s32 %v25_v2, %v44_v35  ;;  %vm48_vm0 = vcmp.ne.s32.totalorder %v34_v42, 0  ;;  %vm50_vm1 = vcmp.lt.s32.totalorder %v34_v42, 0  ;;  %v54_v50 = vadd.s32 17, %v34_v42  ;;  %v120_v23 = vld [vmem:[#allocation2 + $0x110] sm:$0xff]  ;;  %v123_v24 = vld [vmem:[#allocation2 + $0x128] sm:$0xff]  ;;  %v125_v25 = vld [vmem:[#allocation2 + $0x138] sm:$0xff] }
  0x20   :  { %1366 = vmatprep.subr.bf16.mxu0 %v1986_v29  ;;  %1430 = vmatprep.subr.bf16.mxu1 %v1986_v29  ;;  %vm52_vm4 = vmand %vm50_vm1, %vm48_vm0  ;;  %v2020_v2 = vpack.c.bf16 %v112_v57, %v110_v56  ;;  %v2038_v19 = vpack.c.bf16 %v121_v12, %v119_v11  ;;  %v2048_v30 = vpack.c.bf16 %v120_v23, %v118_v22  ;;  %v122_v32 = vld [vmem:[#allocation2 + $0x120] sm:$0xff]  ;;  %v124_v33 = vld [vmem:[#allocation2 + $0x130] sm:$0xff] }
  0x21   :  { %vm49_vm2 = vcmp.ne.s32.totalorder %v45_v43, 0  ;;  %vm51_vm3 = vcmp.lt.s32.totalorder %v45_v43, 0  ;;  %v55_v53 = vadd.s32 17, %v45_v43  ;;  %v56_v60 = vsel %vm52_vm4, %v54_v50, %v34_v42  ;;  %v127_v0 = vld [vmem:[#allocation2 + $0x148] sm:$0xff]  ;;  %v129_v34 = vld [vmem:[#allocation2 + $0x158] sm:$0xff]  ;;  %v126_v39 = vld [vmem:[#allocation2 + $0x140] sm:$0xff] }
  0x22   :  { %vm53_vm5 = vmand %vm51_vm3, %vm49_vm2  ;;  %vm2015_vm6 = vcmp.eq.s32.totalorder %v56_v60, 0  ;;  %v2054_v31 = vpack.c.bf16 %v125_v25, %v123_v24  ;;  %v2058_v35 = vpack.c.bf16 %v124_v33, %v122_v32  ;;  %v2062_v38 = vpack.c.bf16 %v129_v34, %v127_v0  ;;  %v128_v40 = vld [vmem:[#allocation2 + $0x150] sm:$0xff]  ;;  %v131_v41 = vld [vmem:[#allocation2 + $0x168] sm:$0xff] }
  0x23   :  { %1368 = vmatpush1.bf16.msra.mxu0 %v1990_v36  ;;  %1432 = vmatpush1.bf16.msra.mxu1 %v1990_v36  ;;  %v57_v63 = vsel %vm53_vm5, %v55_v53, %v45_v43  ;;  %v60_v4 = vsel %vm2015_vm6, 1.0, %v1928_v3  ;;  %v133_v42 = vld [vmem:[#allocation2 + $0x178] sm:$0xff]  ;;  %v2066_v43 = vpack.c.bf16 %v128_v40, %v126_v39  ;;  %v130_v47 = vld [vmem:[#allocation2 + $0x160] sm:$0xff]  ;;  %v132_v48 = vld [vmem:[#allocation2 + $0x170] sm:$0xff] }
  0x24   :  { %1370 = vmatprep.subr.bf16.mxu0 %v1994_v37  ;;  %1434 = vmatprep.subr.bf16.mxu1 %v1994_v37  ;;  %vm59_vm7 = vcmp.eq.s32.totalorder %v57_v63, 0  ;;  %v2070_v46 = vpack.c.bf16 %v133_v42, %v131_v41  ;;  %v135_v49 = vld [vmem:[#allocation2 + $0x188] sm:$0xff]  ;;  %v137_v50 = vld [vmem:[#allocation2 + $0x198] sm:$0xff]  ;;  %v2074_v51 = vpack.c.bf16 %v132_v48, %v130_v47  ;;  %v134_v53 = vld [vmem:[#allocation2 + $0x180] sm:$0xff] }
  0x25   :  { %v61_v8 = vsel %vm59_vm7, 1.0, %v1928_v3  ;;  %1351 = vmatprep.mubr.msk.f32.mxu0 %vm59_vm7, %v1929_v9  ;;  %v2078_v52 = vpack.c.bf16 %v137_v50, %v135_v49  ;;  %v136_v56 = vld [vmem:[#allocation2 + $0x190] sm:$0xff]  ;;  %v139_v57 = vld [vmem:[#allocation2 + $0x1a8] sm:$0xff]  ;;  %v141_v58 = vld [vmem:[#allocation2 + $0x1b8] sm:$0xff] }
  0x26   :  { %v64_v13 = vcombine.low %v60_v4, %v61_v8  ;;  %v2082_v59 = vpack.c.bf16 %v136_v56, %v134_v53  ;;  %v2086_v60 = vpack.c.bf16 %v141_v58, %v139_v57  ;;  %v138_v61 = vld [vmem:[#allocation2 + $0x1a0] sm:$0xff]  ;;  %v140_v62 = vld [vmem:[#allocation2 + $0x1b0] sm:$0xff]  ;;  %v143_v63 = vld [vmem:[#allocation2 + $0x1c8] sm:$0xff] }
  0x27   :  { %1372 = vmatpush1.bf16.msra.mxu0 %v1998_v44  ;;  %1436 = vmatpush1.bf16.msra.mxu1 %v1998_v44  ;;  %v145_v3 = vld [vmem:[#allocation2 + $0x1d8] sm:$0xff]  ;;  %v2090_v4 = vpack.c.bf16 %v140_v62, %v138_v61  ;;  %v142_v7 = vld [vmem:[#allocation2 + $0x1c0] sm:$0xff]  ;;  %v144_v8 = vld [vmem:[#allocation2 + $0x1d0] sm:$0xff] }
  0x28   :  { %1374 = vmatprep.subr.bf16.mxu0 %v2002_v45  ;;  %1438 = vmatprep.subr.bf16.mxu1 %v2002_v45  ;;  %v71_v18 = vrot.slane %v64_v13, %v2029_v16  ;;  %v2094_v6 = vpack.c.bf16 %v145_v3, %v143_v63  ;;  %v147_v11 = vld [vmem:[#allocation2 + $0x1e8] sm:$0xff]  ;;  %v149_v12 = vld [vmem:[#allocation2 + $0x1f8] sm:$0xff]  ;;  %v2098_v13 = vpack.c.bf16 %v144_v8, %v142_v7  ;;  %v146_v22 = vld [vmem:[#allocation2 + $0x1e0] sm:$0xff] }
  0x29   :  { %v148_v23 = vld [vmem:[#allocation2 + $0x1f0] sm:$0xff]  ;;  %v718_v0 = vld [vmem:[#allocation2 + $0x40] sm:$0xff] }
  0x2a   :  { %v78_v26 = vrot.slane %v71_v18, %v2029_v16  ;;  %v2102_v18 = vpack.c.bf16 %v149_v12, %v147_v11  ;;  %v2106_v24 = vpack.c.bf16 %v148_v23, %v146_v22  ;;  %v720_v34 = vld [vmem:[#allocation2 + $0x50] sm:$0xff]  ;;  %v722_v41 = vld [vmem:[#allocation2 + $0x60] sm:$0xff] }
  0x2b   :  { %1376 = vmatpush1.bf16.msra.mxu0 %v2006_v54  ;;  %1440 = vmatpush1.bf16.msra.mxu1 %v2006_v54  ;;  %v2203_v39 = vpack.c.bf16 %v720_v34, %v718_v0  ;;  %v724_v42 = vld [vmem:[#allocation2 + $0x70] sm:$0xff]  ;;  %v726_v49 = vld [vmem:[#allocation2 + $0x80] sm:$0xff]  ;;  %v761_v0 = vld [vmem:[#allocation2 + $0x198] sm:$0xff] }
  0x2c   :  { %1378 = vmatprep.subr.bf16.mxu0 %v2010_v55  ;;  %1442 = vmatprep.subr.bf16.mxu1 %v2010_v55  ;;  %84 = vst.msk [vmem:[#allocation5] ss:$8 sm:$0x3] %vm2043_vm8, %v78_v26  ;;  %v2209_v47 = vpack.c.bf16 %v724_v42, %v722_v41  ;;  %v728_v50 = vld [vmem:[#allocation2 + $0x90] sm:$0xff]  ;;  %v730_v57 = vld [vmem:[#allocation2 + $0xa0] sm:$0xff]  ;;  %v763_v42 = vld [vmem:[#allocation2 + $0x1a8] sm:$0xff] }
  0x2d   :  { %v2215_v53 = vpack.c.bf16 %v728_v50, %v726_v49  ;;  %v732_v58 = vld [vmem:[#allocation2 + $0xb0] sm:$0xff]  ;;  %v734_v63 = vld [vmem:[#allocation2 + $0xc0] sm:$0xff] }
  0x2e   :  { %v2221_v61 = vpack.c.bf16 %v732_v58, %v730_v57  ;;  %v736_v3 = vld [vmem:[#allocation2 + $0xd0] sm:$0xff]  ;;  %v738_v11 = vld [vmem:[#allocation2 + $0xe0] sm:$0xff]  ;;  %v769_v57 = vld [vmem:[#allocation2 + $0x1d8] sm:$0xff] }
  0x2f   :  { %1380 = vmatpush1.bf16.msra.mxu0 %v2020_v2  ;;  %1444 = vmatpush1.bf16.msra.mxu1 %v2020_v2  ;;  %v2227_v7 = vpack.c.bf16 %v736_v3, %v734_v63  ;;  %v740_v12 = vld [vmem:[#allocation2 + $0xf0] sm:$0xff]  ;;  %v762_v50 = vld [vmem:[#allocation2 + $0x1a0] sm:$0xff]  ;;  %v771_v3 = vld [vmem:[#allocation2 + $0x1e8] sm:$0xff] }
  0x30   :  { %1382 = vmatprep.subr.bf16.mxu0 %v2026_v5  ;;  %1446 = vmatprep.subr.bf16.mxu1 %v2026_v5  ;;  %v2233_v22 = vpack.c.bf16 %v740_v12, %v738_v11  ;;  %v760_v41 = vld [vmem:[#allocation2 + $0x190] sm:$0xff] }
  0x31   :  { %v768_v63 = vld [vmem:[#allocation2 + $0x1d0] sm:$0xff] }
  0x33   :  { %1384 = vmatpush1.bf16.msra.mxu0 %v2033_v17  ;;  %1448 = vmatpush1.bf16.msra.mxu1 %v2033_v17 }
  0x34   :  { %1386 = vmatprep.subr.bf16.mxu0 %v2038_v19  ;;  %1450 = vmatprep.subr.bf16.mxu1 %v2038_v19 }
  0x37   :  { %1388 = vmatpush1.bf16.msra.mxu0 %v2048_v30  ;;  %1452 = vmatpush1.bf16.msra.mxu1 %v2048_v30 }
  0x38   :  { %1390 = vmatprep.subr.bf16.mxu0 %v2054_v31  ;;  %1454 = vmatprep.subr.bf16.mxu1 %v2054_v31 }
  0x3b   :  { %1392 = vmatpush1.bf16.msra.mxu0 %v2058_v35  ;;  %1456 = vmatpush1.bf16.msra.mxu1 %v2058_v35 }
  0x3c   :  { %1394 = vmatprep.subr.bf16.mxu0 %v2062_v38  ;;  %1458 = vmatprep.subr.bf16.mxu1 %v2062_v38 }
  0x3f   :  { %1396 = vmatpush1.bf16.msra.mxu0 %v2066_v43  ;;  %1460 = vmatpush1.bf16.msra.mxu1 %v2066_v43 }
  0x40   :  { %1398 = vmatprep.subr.bf16.mxu0 %v2070_v46  ;;  %1462 = vmatprep.subr.bf16.mxu1 %v2070_v46 }
  0x43   :  { %1400 = vmatpush1.bf16.msra.mxu0 %v2074_v51  ;;  %1464 = vmatpush1.bf16.msra.mxu1 %v2074_v51 }
  0x44   :  { %1402 = vmatprep.subr.bf16.mxu0 %v2078_v52  ;;  %1466 = vmatprep.subr.bf16.mxu1 %v2078_v52 }
  0x47   :  { %1404 = vmatpush1.bf16.msra.mxu0 %v2082_v59  ;;  %1468 = vmatpush1.bf16.msra.mxu1 %v2082_v59 }
  0x48   :  { %1406 = vmatprep.subr.bf16.mxu0 %v2086_v60  ;;  %1470 = vmatprep.subr.bf16.mxu1 %v2086_v60 }
  0x4b   :  { %1408 = vmatpush1.bf16.msra.mxu0 %v2090_v4  ;;  %1472 = vmatpush1.bf16.msra.mxu1 %v2090_v4 }
  0x4c   :  { %1410 = vmatprep.subr.bf16.mxu0 %v2094_v6  ;;  %1474 = vmatprep.subr.bf16.mxu1 %v2094_v6 }
  0x4f   :  { %1412 = vmatpush1.bf16.msra.mxu0 %v2098_v13  ;;  %1476 = vmatpush1.bf16.msra.mxu1 %v2098_v13 }
  0x50   :  { %1414 = vmatprep.subr.bf16.mxu0 %v2102_v18  ;;  %1478 = vmatprep.subr.bf16.mxu1 %v2102_v18 }
  0x53   :  { %1416 = vmatpush1.bf16.msra.mxu0 %v2106_v24  ;;  %1480 = vmatpush1.bf16.msra.mxu1 %v2106_v24 }
  0x54   :  { %1482 = vmatprep.subr.bf16.mxu0 %v1963_v10  ;;  %1546 = vmatprep.subr.bf16.mxu1 %v1963_v10 }
  0x56   :  { %1352 = vmatmul.mubr.msk.f32.vlgmr.msra.gmra.mrb[0].mxu0 %vm2015_vm6, %v1929_v9 }
  0x57   :  { %1484 = vmatpush1.bf16.msra.mxu0 %v1965_v14 }
  0x58   :  { %1486 = vmatprep.subr.bf16.mxu0 %v1967_v15 }
  0x5b   :  { %1488 = vmatpush1.bf16.msra.mxu0 %v1972_v20 }
  0x5c   :  { %1490 = vmatprep.subr.bf16.mxu0 %v1976_v21 }
  0x5f   :  { %1492 = vmatpush1.bf16.msra.mxu0 %v1982_v28 }
  0x60   :  { %1494 = vmatprep.subr.bf16.mxu0 %v1986_v29 }
  0x63   :  { %1496 = vmatpush1.bf16.msra.mxu0 %v1990_v36 }
  0x64   :  { %1498 = vmatprep.subr.bf16.mxu0 %v1994_v37 }
  0x67   :  { %1500 = vmatpush1.bf16.msra.mxu0 %v1998_v44 }
  0x68   :  { %1502 = vmatprep.subr.bf16.mxu0 %v2002_v45 }
  0x6b   :  { %1504 = vmatpush1.bf16.msra.mxu0 %v2006_v54 }
  0x6c   :  { %1506 = vmatprep.subr.bf16.mxu0 %v2010_v55 }
  0x6f   :  { %1508 = vmatpush1.bf16.msra.mxu0 %v2020_v2 }
  0x70   :  { %1510 = vmatprep.subr.bf16.mxu0 %v2026_v5 }
  0x73   :  { %1512 = vmatpush1.bf16.msra.mxu0 %v2033_v17 }
  0x74   :  { %1514 = vmatprep.subr.bf16.mxu0 %v2038_v19 }
  0x77   :  { %1516 = vmatpush1.bf16.msra.mxu0 %v2048_v30 }
  0x78   :  { %1518 = vmatprep.subr.bf16.mxu0 %v2054_v31 }
  0x7b   :  { %1520 = vmatpush1.bf16.msra.mxu0 %v2058_v35 }
  0x7c   :  { %1522 = vmatprep.subr.bf16.mxu0 %v2062_v38 }
  0x7f   :  { %1524 = vmatpush1.bf16.msra.mxu0 %v2066_v43 }
  0x80   :  { %1526 = vmatprep.subr.bf16.mxu0 %v2070_v46 }
  0x83   :  { %1528 = vmatpush1.bf16.msra.mxu0 %v2074_v51 }
  0x84   :  { %1530 = vmatprep.subr.bf16.mxu0 %v2078_v52 }
  0x87   :  { %1532 = vmatpush1.bf16.msra.mxu0 %v2082_v59 }
  0x88   :  { %1534 = vmatprep.subr.bf16.mxu0 %v2086_v60 }
  0x8b   :  { %1536 = vmatpush1.bf16.msra.mxu0 %v2090_v4 }
  0x8c   :  { %1538 = vmatprep.subr.bf16.mxu0 %v2094_v6 }
  0x8f   :  { %1540 = vmatpush1.bf16.msra.mxu0 %v2098_v13 }
  0x90   :  { %1542 = vmatprep.subr.bf16.mxu0 %v2102_v18 }
  0x93   :  { %1544 = vmatpush1.bf16.msra.mxu0 %v2106_v24 }
 0x129   :  { %v216_v10 = vpop.f32.mrb[0].mxu0 }
 0x12a   :  { %v218_v1 = vpop.f32.mrb[1].mxu0 }
 0x12b   :  { %v223_v9 = vcombine.low %v216_v10, %v218_v1  ;;  %370 = vmatprep.mubr.f32.mxu1 %v218_v1  ;;  %v747_v1 = vld [vmem:[#allocation2 + $0x128] sm:$0xff] }
 0x12c   :  { %371 = vmatmul.mubr.f32.vlgmr.msra.gmra.mrb[0].mxu1 %v216_v10  ;;  %v744_v10 = vld [vmem:[#allocation2 + $0x110] sm:$0xff] }
 0x12d   :  { %v230_v25 = vrot.slane %v223_v9, %v2029_v16  ;;  %1548 = vmatpush1.bf16.msra.mxu1 %v1965_v14  ;;  %v749_v9 = vld [vmem:[#allocation2 + $0x138] sm:$0xff] }
 0x12e   :  { %1550 = vmatprep.subr.bf16.mxu1 %v1967_v15 }
 0x12f   :  { %v237_v26 = vrot.slane %v230_v25, %v2029_v16 }
 0x131   :  { %240 = vst.msk [vmem:[#allocation5 + $0x1] ss:$8 sm:$0x3] %vm2043_vm8, %v237_v26  ;;  %1552 = vmatpush1.bf16.msra.mxu1 %v1972_v20  ;;  %v2242_v26 = vpack.c.bf16 %v749_v9, %v747_v1  ;;  %v770_v1 = vld [vmem:[#allocation2 + $0x1e0] sm:$0xff]  ;;  %v772_v9 = vld [vmem:[#allocation2 + $0x1f0] sm:$0xff] }
 0x132   :  { %1554 = vmatprep.subr.bf16.mxu1 %v1976_v21 }
 0x135   :  { %1556 = vmatpush1.bf16.msra.mxu1 %v1982_v28 }
 0x136   :  { %1558 = vmatprep.subr.bf16.mxu1 %v1986_v29  ;;  %v711_v29 = vld [vmem:[#allocation2 + $0x8] sm:$0xff] }
 0x139   :  { %1560 = vmatpush1.bf16.msra.mxu1 %v1990_v36  ;;  %v713_v36 = vld [vmem:[#allocation2 + $0x18] sm:$0xff] }
 0x13a   :  { %1562 = vmatprep.subr.bf16.mxu1 %v1994_v37  ;;  %v710_v37 = vld [vmem:[#allocation2] sm:$0xff] }
 0x13d   :  { %1564 = vmatpush1.bf16.msra.mxu1 %v1998_v44  ;;  %v2188_v44 = vpack.c.bf16 %v713_v36, %v711_v29  ;;  %v750_v36 = vld [vmem:[#allocation2 + $0x140] sm:$0xff] }
 0x13e   :  { %1566 = vmatprep.subr.bf16.mxu1 %v2002_v45  ;;  %v712_v45 = vld [vmem:[#allocation2 + $0x10] sm:$0xff] }
 0x13f   :  { %1610 = vmatprep.subr.bf16.mxu0 %v2188_v44 }
 0x141   :  { %1568 = vmatpush1.bf16.msra.mxu1 %v2006_v54  ;;  %v715_v54 = vld [vmem:[#allocation2 + $0x28] sm:$0xff] }
 0x142   :  { %1570 = vmatprep.subr.bf16.mxu1 %v2010_v55  ;;  %v717_v55 = vld [vmem:[#allocation2 + $0x38] sm:$0xff] }
 0x145   :  { %1572 = vmatpush1.bf16.msra.mxu1 %v2020_v2  ;;  %v2190_v2 = vpack.c.bf16 %v712_v45, %v710_v37  ;;  %v752_v37 = vld [vmem:[#allocation2 + $0x150] sm:$0xff]  ;;  %v755_v45 = vld [vmem:[#allocation2 + $0x168] sm:$0xff] }
 0x146   :  { %1574 = vmatprep.subr.bf16.mxu1 %v2026_v5  ;;  %v2192_v5 = vpack.c.bf16 %v717_v55, %v715_v54  ;;  %v757_v54 = vld [vmem:[#allocation2 + $0x178] sm:$0xff]  ;;  %v2251_v55 = vpack.c.bf16 %v752_v37, %v750_v36 }
 0x149   :  { %1576 = vmatpush1.bf16.msra.mxu1 %v2033_v17  ;;  %v714_v17 = vld [vmem:[#allocation2 + $0x20] sm:$0xff] }
 0x14a   :  { %1578 = vmatprep.subr.bf16.mxu1 %v2038_v19  ;;  %v716_v19 = vld [vmem:[#allocation2 + $0x30] sm:$0xff] }
 0x14b   :  { %v2197_v32 = vpack.c.bf16 %v716_v19, %v714_v17  ;;  %v2254_v17 = vpack.c.bf16 %v757_v54, %v755_v45  ;;  %v754_v19 = vld [vmem:[#allocation2 + $0x160] sm:$0xff] }
 0x14d   :  { %1580 = vmatpush1.bf16.msra.mxu1 %v2048_v30  ;;  %v719_v30 = vld [vmem:[#allocation2 + $0x48] sm:$0xff] }
 0x14e   :  { %1582 = vmatprep.subr.bf16.mxu1 %v2054_v31  ;;  %v721_v31 = vld [vmem:[#allocation2 + $0x58] sm:$0xff] }
 0x14f   :  { %v2200_v33 = vpack.c.bf16 %v721_v31, %v719_v30  ;;  %v756_v30 = vld [vmem:[#allocation2 + $0x170] sm:$0xff]  ;;  %v759_v31 = vld [vmem:[#allocation2 + $0x188] sm:$0xff] }
 0x150   :  { %v2257_v34 = vpack.c.bf16 %v756_v30, %v754_v19 }
 0x151   :  { %1584 = vmatpush1.bf16.msra.mxu1 %v2058_v35  ;;  %v723_v35 = vld [vmem:[#allocation2 + $0x68] sm:$0xff] }
 0x152   :  { %1586 = vmatprep.subr.bf16.mxu1 %v2062_v38  ;;  %v725_v38 = vld [vmem:[#allocation2 + $0x78] sm:$0xff] }
 0x153   :  { %v2206_v40 = vpack.c.bf16 %v725_v38, %v723_v35  ;;  %v2260_v35 = vpack.c.bf16 %v761_v0, %v759_v31  ;;  %v758_v38 = vld [vmem:[#allocation2 + $0x180] sm:$0xff] }
 0x155   :  { %1588 = vmatpush1.bf16.msra.mxu1 %v2066_v43  ;;  %v727_v43 = vld [vmem:[#allocation2 + $0x88] sm:$0xff] }
 0x156   :  { %1590 = vmatprep.subr.bf16.mxu1 %v2070_v46  ;;  %v729_v46 = vld [vmem:[#allocation2 + $0x98] sm:$0xff] }
 0x157   :  { %v2212_v48 = vpack.c.bf16 %v729_v46, %v727_v43  ;;  %v765_v43 = vld [vmem:[#allocation2 + $0x1b8] sm:$0xff]  ;;  %v2263_v46 = vpack.c.bf16 %v760_v41, %v758_v38 }
 0x158   :  { %v2266_v49 = vpack.c.bf16 %v765_v43, %v763_v42 }
 0x159   :  { %1592 = vmatpush1.bf16.msra.mxu1 %v2074_v51  ;;  %v731_v51 = vld [vmem:[#allocation2 + $0xa8] sm:$0xff] }
 0x15a   :  { %1594 = vmatprep.subr.bf16.mxu1 %v2078_v52  ;;  %v733_v52 = vld [vmem:[#allocation2 + $0xb8] sm:$0xff] }
 0x15b   :  { %v2218_v56 = vpack.c.bf16 %v733_v52, %v731_v51  ;;  %v764_v51 = vld [vmem:[#allocation2 + $0x1b0] sm:$0xff]  ;;  %v767_v52 = vld [vmem:[#allocation2 + $0x1c8] sm:$0xff] }
 0x15c   :  { %v2269_v58 = vpack.c.bf16 %v764_v51, %v762_v50 }
 0x15d   :  { %1596 = vmatpush1.bf16.msra.mxu1 %v2082_v59  ;;  %v735_v59 = vld [vmem:[#allocation2 + $0xc8] sm:$0xff] }
 0x15e   :  { %1598 = vmatprep.subr.bf16.mxu1 %v2086_v60  ;;  %v737_v60 = vld [vmem:[#allocation2 + $0xd8] sm:$0xff] }
 0x15f   :  { %v2224_v62 = vpack.c.bf16 %v737_v60, %v735_v59  ;;  %v2272_v59 = vpack.c.bf16 %v769_v57, %v767_v52  ;;  %v766_v60 = vld [vmem:[#allocation2 + $0x1c0] sm:$0xff] }
 0x161   :  { %1600 = vmatpush1.bf16.msra.mxu1 %v2090_v4  ;;  %v739_v4 = vld [vmem:[#allocation2 + $0xe8] sm:$0xff] }
 0x162   :  { %1602 = vmatprep.subr.bf16.mxu1 %v2094_v6  ;;  %v741_v6 = vld [vmem:[#allocation2 + $0xf8] sm:$0xff] }
 0x163   :  { %v2230_v8 = vpack.c.bf16 %v741_v6, %v739_v4  ;;  %v773_v4 = vld [vmem:[#allocation2 + $0x1f8] sm:$0xff]  ;;  %v2275_v6 = vpack.c.bf16 %v768_v63, %v766_v60 }
 0x164   :  { %v2278_v11 = vpack.c.bf16 %v773_v4, %v771_v3 }
 0x165   :  { %1604 = vmatpush1.bf16.msra.mxu1 %v2098_v13  ;;  %v743_v13 = vld [vmem:[#allocation2 + $0x108] sm:$0xff] }
 0x166   :  { %1606 = vmatprep.subr.bf16.mxu1 %v2102_v18  ;;  %v745_v18 = vld [vmem:[#allocation2 + $0x118] sm:$0xff] }
 0x167   :  { %v2236_v23 = vpack.c.bf16 %v745_v18, %v743_v13 }
 0x169   :  { %1608 = vmatpush1.bf16.msra.mxu1 %v2106_v24  ;;  %v742_v24 = vld [vmem:[#allocation2 + $0x100] sm:$0xff] }
 0x16a   :  { %1674 = vmatprep.subr.bf16.mxu1 %v2188_v44  ;;  %v2239_v25 = vpack.c.bf16 %v744_v10, %v742_v24 }
 0x1ff   :  { %v372_v14 = vpop.f32.mrb[0].mxu1 }
 0x200   :  { %v374_v15 = vpop.f32.mrb[1].mxu1 }
 0x201   :  { %v379_v20 = vcombine.low %v372_v14, %v374_v15  ;;  %526 = vmatprep.mubr.f32.mxu0 %v374_v15  ;;  %v748_v15 = vld [vmem:[#allocation2 + $0x130] sm:$0xff] }
 0x202   :  { %527 = vmatmul.mubr.f32.vlgmr.msra.gmra.mrb[2].mxu0 %v372_v14  ;;  %v746_v14 = vld [vmem:[#allocation2 + $0x120] sm:$0xff] }
 0x203   :  { %v386_v21 = vrot.slane %v379_v20, %v2029_v16  ;;  %1612 = vmatpush1.bf16.msra.mxu0 %v2190_v2  ;;  %v751_v20 = vld [vmem:[#allocation2 + $0x148] sm:$0xff] }
 0x204   :  { %1614 = vmatprep.subr.bf16.mxu0 %v2192_v5 }
 0x205   :  { %v393_v28 = vrot.slane %v386_v21, %v2029_v16  ;;  %v753_v21 = vld [vmem:[#allocation2 + $0x158] sm:$0xff] }
 0x206   :  { %v2248_v29 = vpack.c.bf16 %v753_v21, %v751_v20 }
 0x207   :  { %396 = vst.msk [vmem:[#allocation5 + $0x2] ss:$8 sm:$0x3] %vm2043_vm8, %v393_v28  ;;  %1616 = vmatpush1.bf16.msra.mxu0 %v2197_v32  ;;  %v2245_v28 = vpack.c.bf16 %v748_v15, %v746_v14  ;;  %v2316_v14 = vpack.c.bf16 %v772_v9, %v770_v1 }
 0x208   :  { %1618 = vmatprep.subr.bf16.mxu0 %v2200_v33 }
 0x20b   :  { %1620 = vmatpush1.bf16.msra.mxu0 %v2203_v39 }
 0x20c   :  { %1622 = vmatprep.subr.bf16.mxu0 %v2206_v40 }
 0x20f   :  { %1624 = vmatpush1.bf16.msra.mxu0 %v2209_v47 }
 0x210   :  { %1626 = vmatprep.subr.bf16.mxu0 %v2212_v48 }
 0x213   :  { %1628 = vmatpush1.bf16.msra.mxu0 %v2215_v53 }
 0x214   :  { %1630 = vmatprep.subr.bf16.mxu0 %v2218_v56 }
 0x217   :  { %1632 = vmatpush1.bf16.msra.mxu0 %v2221_v61 }
 0x218   :  { %1634 = vmatprep.subr.bf16.mxu0 %v2224_v62 }
 0x21b   :  { %1636 = vmatpush1.bf16.msra.mxu0 %v2227_v7 }
 0x21c   :  { %1638 = vmatprep.subr.bf16.mxu0 %v2230_v8 }
 0x21f   :  { %1640 = vmatpush1.bf16.msra.mxu0 %v2233_v22 }
 0x220   :  { %1642 = vmatprep.subr.bf16.mxu0 %v2236_v23 }
 0x223   :  { %1644 = vmatpush1.bf16.msra.mxu0 %v2239_v25 }
 0x224   :  { %1646 = vmatprep.subr.bf16.mxu0 %v2242_v26 }
 0x227   :  { %1648 = vmatpush1.bf16.msra.mxu0 %v2245_v28 }
 0x228   :  { %1650 = vmatprep.subr.bf16.mxu0 %v2248_v29 }
 0x22b   :  { %1652 = vmatpush1.bf16.msra.mxu0 %v2251_v55 }
 0x22c   :  { %1654 = vmatprep.subr.bf16.mxu0 %v2254_v17 }
 0x22f   :  { %1656 = vmatpush1.bf16.msra.mxu0 %v2257_v34 }
 0x230   :  { %1658 = vmatprep.subr.bf16.mxu0 %v2260_v35 }
 0x233   :  { %1660 = vmatpush1.bf16.msra.mxu0 %v2263_v46 }
 0x234   :  { %1662 = vmatprep.subr.bf16.mxu0 %v2266_v49 }
 0x237   :  { %1664 = vmatpush1.bf16.msra.mxu0 %v2269_v58 }
 0x238   :  { %1666 = vmatprep.subr.bf16.mxu0 %v2272_v59 }
 0x23b   :  { %1668 = vmatpush1.bf16.msra.mxu0 %v2275_v6 }
 0x23c   :  { %1670 = vmatprep.subr.bf16.mxu0 %v2278_v11 }
 0x23f   :  { %1672 = vmatpush1.bf16.msra.mxu0 %v2316_v14 }
 0x240   :  { %1738 = vmatprep.subr.bf16.mxu0 %v2188_v44 }
 0x2d5   :  { %v528_v12 = vpop.f32.mrb[2].mxu0 }
 0x2d6   :  { %v530_v13 = vpop.f32.mrb[3].mxu0 }
 0x2d7   :  { %v535_v18 = vcombine.low %v528_v12, %v530_v13  ;;  %682 = vmatprep.mubr.f32.mxu1 %v530_v13 }
 0x2d8   :  { %683 = vmatmul.mubr.f32.vlgmr.msra.gmra.mrb[2].mxu1 %v528_v12 }
 0x2d9   :  { %v542_v24 = vrot.slane %v535_v18, %v2029_v16  ;;  %1676 = vmatpush1.bf16.msra.mxu1 %v2190_v2 }
 0x2da   :  { %1678 = vmatprep.subr.bf16.mxu1 %v2192_v5 }
 0x2db   :  { %v549_v10 = vrot.slane %v542_v24, %v2029_v16 }
 0x2dd   :  { %552 = vst.msk [vmem:[#allocation5 + $0x3] ss:$8 sm:$0x3] %vm2043_vm8, %v549_v10  ;;  %1680 = vmatpush1.bf16.msra.mxu1 %v2197_v32 }
 0x2de   :  { %1682 = vmatprep.subr.bf16.mxu1 %v2200_v33 }
 0x2e1   :  { %1684 = vmatpush1.bf16.msra.mxu1 %v2203_v39 }
 0x2e2   :  { %1686 = vmatprep.subr.bf16.mxu1 %v2206_v40 }
 0x2e5   :  { %1688 = vmatpush1.bf16.msra.mxu1 %v2209_v47 }
 0x2e6   :  { %1690 = vmatprep.subr.bf16.mxu1 %v2212_v48 }
 0x2e9   :  { %1692 = vmatpush1.bf16.msra.mxu1 %v2215_v53 }
 0x2ea   :  { %1694 = vmatprep.subr.bf16.mxu1 %v2218_v56 }
 0x2ed   :  { %1696 = vmatpush1.bf16.msra.mxu1 %v2221_v61 }
 0x2ee   :  { %1698 = vmatprep.subr.bf16.mxu1 %v2224_v62 }
 0x2f1   :  { %1700 = vmatpush1.bf16.msra.mxu1 %v2227_v7 }
 0x2f2   :  { %1702 = vmatprep.subr.bf16.mxu1 %v2230_v8 }
 0x2f5   :  { %1704 = vmatpush1.bf16.msra.mxu1 %v2233_v22 }
 0x2f6   :  { %1706 = vmatprep.subr.bf16.mxu1 %v2236_v23 }
 0x2f9   :  { %1708 = vmatpush1.bf16.msra.mxu1 %v2239_v25 }
 0x2fa   :  { %1710 = vmatprep.subr.bf16.mxu1 %v2242_v26 }
 0x2fd   :  { %1712 = vmatpush1.bf16.msra.mxu1 %v2245_v28 }
 0x2fe   :  { %1714 = vmatprep.subr.bf16.mxu1 %v2248_v29 }
 0x301   :  { %1716 = vmatpush1.bf16.msra.mxu1 %v2251_v55 }
 0x302   :  { %1718 = vmatprep.subr.bf16.mxu1 %v2254_v17 }
 0x305   :  { %1720 = vmatpush1.bf16.msra.mxu1 %v2257_v34 }
 0x306   :  { %1722 = vmatprep.subr.bf16.mxu1 %v2260_v35 }
 0x309   :  { %1724 = vmatpush1.bf16.msra.mxu1 %v2263_v46 }
 0x30a   :  { %1726 = vmatprep.subr.bf16.mxu1 %v2266_v49 }
 0x30d   :  { %1728 = vmatpush1.bf16.msra.mxu1 %v2269_v58 }
 0x30e   :  { %1730 = vmatprep.subr.bf16.mxu1 %v2272_v59 }
 0x311   :  { %1732 = vmatpush1.bf16.msra.mxu1 %v2275_v6 }
 0x312   :  { %1734 = vmatprep.subr.bf16.mxu1 %v2278_v11 }
 0x315   :  { %1736 = vmatpush1.bf16.msra.mxu1 %v2316_v14 }
 0x316   :  { %1802 = vmatprep.subr.bf16.mxu1 %v2188_v44 }
 0x3ab   :  { %v684_v15 = vpop.f32.mrb[2].mxu1 }
 0x3ac   :  { %v686_v20 = vpop.f32.mrb[3].mxu1 }
 0x3ad   :  { %v691_v21 = vcombine.low %v684_v15, %v686_v20  ;;  %838 = vmatprep.mubr.f32.mxu0 %v686_v20 }
 0x3ae   :  { %839 = vmatmul.mubr.f32.vlgmr.msra.gmra.mrb[4].mxu0 %v684_v15 }
 0x3af   :  { %v698_v36 = vrot.slane %v691_v21, %v2029_v16  ;;  %1740 = vmatpush1.bf16.msra.mxu0 %v2190_v2 }
 0x3b0   :  { %1742 = vmatprep.subr.bf16.mxu0 %v2192_v5 }
 0x3b1   :  { %v705_v37 = vrot.slane %v698_v36, %v2029_v16 }
 0x3b3   :  { %708 = vst.msk [vmem:[#allocation5 + $0x4] ss:$8 sm:$0x3] %vm2043_vm8, %v705_v37  ;;  %1744 = vmatpush1.bf16.msra.mxu0 %v2197_v32 }
 0x3b4   :  { %1746 = vmatprep.subr.bf16.mxu0 %v2200_v33 }
 0x3b7   :  { %1748 = vmatpush1.bf16.msra.mxu0 %v2203_v39 }
 0x3b8   :  { %1750 = vmatprep.subr.bf16.mxu0 %v2206_v40 }
 0x3bb   :  { %1752 = vmatpush1.bf16.msra.mxu0 %v2209_v47 }
 0x3bc   :  { %1754 = vmatprep.subr.bf16.mxu0 %v2212_v48 }
 0x3bf   :  { %1756 = vmatpush1.bf16.msra.mxu0 %v2215_v53 }
 0x3c0   :  { %1758 = vmatprep.subr.bf16.mxu0 %v2218_v56 }
 0x3c3   :  { %1760 = vmatpush1.bf16.msra.mxu0 %v2221_v61 }
 0x3c4   :  { %1762 = vmatprep.subr.bf16.mxu0 %v2224_v62 }
 0x3c7   :  { %1764 = vmatpush1.bf16.msra.mxu0 %v2227_v7 }
 0x3c8   :  { %1766 = vmatprep.subr.bf16.mxu0 %v2230_v8 }
 0x3cb   :  { %1768 = vmatpush1.bf16.msra.mxu0 %v2233_v22 }
 0x3cc   :  { %1770 = vmatprep.subr.bf16.mxu0 %v2236_v23 }
 0x3cf   :  { %1772 = vmatpush1.bf16.msra.mxu0 %v2239_v25 }
 0x3d0   :  { %1774 = vmatprep.subr.bf16.mxu0 %v2242_v26 }
 0x3d3   :  { %1776 = vmatpush1.bf16.msra.mxu0 %v2245_v28 }
 0x3d4   :  { %1778 = vmatprep.subr.bf16.mxu0 %v2248_v29 }
 0x3d7   :  { %1780 = vmatpush1.bf16.msra.mxu0 %v2251_v55 }
 0x3d8   :  { %1782 = vmatprep.subr.bf16.mxu0 %v2254_v17 }
 0x3db   :  { %1784 = vmatpush1.bf16.msra.mxu0 %v2257_v34 }
 0x3dc   :  { %1786 = vmatprep.subr.bf16.mxu0 %v2260_v35 }
 0x3df   :  { %1788 = vmatpush1.bf16.msra.mxu0 %v2263_v46 }
 0x3e0   :  { %1790 = vmatprep.subr.bf16.mxu0 %v2266_v49 }
 0x3e3   :  { %1792 = vmatpush1.bf16.msra.mxu0 %v2269_v58 }
 0x3e4   :  { %1794 = vmatprep.subr.bf16.mxu0 %v2272_v59 }
 0x3e7   :  { %1796 = vmatpush1.bf16.msra.mxu0 %v2275_v6 }
 0x3e8   :  { %1798 = vmatprep.subr.bf16.mxu0 %v2278_v11 }
 0x3eb   :  { %1800 = vmatpush1.bf16.msra.mxu0 %v2316_v14 }
 0x481   :  { %v840_v44 = vpop.f32.mrb[4].mxu0 }
 0x482   :  { %v842_v45 = vpop.f32.mrb[5].mxu0 }
 0x483   :  { %v847_v54 = vcombine.low %v840_v44, %v842_v45  ;;  %994 = vmatprep.mubr.f32.mxu1 %v842_v45 }
 0x484   :  { %995 = vmatmul.mubr.f32.vlgmr.msra.gmra.mrb[4].mxu1 %v840_v44 }
 0x485   :  { %v854_v19 = vrot.slane %v847_v54, %v2029_v16  ;;  %1804 = vmatpush1.bf16.msra.mxu1 %v2190_v2 }
 0x486   :  { %1806 = vmatprep.subr.bf16.mxu1 %v2192_v5 }
 0x487   :  { %v861_v30 = vrot.slane %v854_v19, %v2029_v16 }
 0x489   :  { %864 = vst.msk [vmem:[#allocation5 + $0x5] ss:$8 sm:$0x3] %vm2043_vm8, %v861_v30  ;;  %1808 = vmatpush1.bf16.msra.mxu1 %v2197_v32 }
 0x48a   :  { %1810 = vmatprep.subr.bf16.mxu1 %v2200_v33 }
 0x48d   :  { %1812 = vmatpush1.bf16.msra.mxu1 %v2203_v39 }
 0x48e   :  { %1814 = vmatprep.subr.bf16.mxu1 %v2206_v40 }
 0x491   :  { %1816 = vmatpush1.bf16.msra.mxu1 %v2209_v47 }
 0x492   :  { %1818 = vmatprep.subr.bf16.mxu1 %v2212_v48 }
 0x495   :  { %1820 = vmatpush1.bf16.msra.mxu1 %v2215_v53 }
 0x496   :  { %1822 = vmatprep.subr.bf16.mxu1 %v2218_v56 }
 0x499   :  { %1824 = vmatpush1.bf16.msra.mxu1 %v2221_v61 }
 0x49a   :  { %1826 = vmatprep.subr.bf16.mxu1 %v2224_v62 }
 0x49d   :  { %1828 = vmatpush1.bf16.msra.mxu1 %v2227_v7 }
 0x49e   :  { %1830 = vmatprep.subr.bf16.mxu1 %v2230_v8 }
 0x4a1   :  { %1832 = vmatpush1.bf16.msra.mxu1 %v2233_v22 }
 0x4a2   :  { %1834 = vmatprep.subr.bf16.mxu1 %v2236_v23 }
 0x4a5   :  { %1836 = vmatpush1.bf16.msra.mxu1 %v2239_v25 }
 0x4a6   :  { %1838 = vmatprep.subr.bf16.mxu1 %v2242_v26 }
 0x4a9   :  { %1840 = vmatpush1.bf16.msra.mxu1 %v2245_v28 }
 0x4aa   :  { %1842 = vmatprep.subr.bf16.mxu1 %v2248_v29 }
 0x4ad   :  { %1844 = vmatpush1.bf16.msra.mxu1 %v2251_v55 }
 0x4ae   :  { %1846 = vmatprep.subr.bf16.mxu1 %v2254_v17 }
 0x4b1   :  { %1848 = vmatpush1.bf16.msra.mxu1 %v2257_v34 }
 0x4b2   :  { %1850 = vmatprep.subr.bf16.mxu1 %v2260_v35 }
 0x4b5   :  { %1852 = vmatpush1.bf16.msra.mxu1 %v2263_v46 }
 0x4b6   :  { %1854 = vmatprep.subr.bf16.mxu1 %v2266_v49 }
 0x4b9   :  { %1856 = vmatpush1.bf16.msra.mxu1 %v2269_v58 }
 0x4ba   :  { %1858 = vmatprep.subr.bf16.mxu1 %v2272_v59 }
 0x4bd   :  { %1860 = vmatpush1.bf16.msra.mxu1 %v2275_v6 }
 0x4be   :  { %1862 = vmatprep.subr.bf16.mxu1 %v2278_v11 }
 0x4c1   :  { %1864 = vmatpush1.bf16.msra.mxu1 %v2316_v14 }
 0x557   :  { %v996_v2 = vpop.f32.mrb[4].mxu1 }
 0x558   :  { %v998_v5 = vpop.f32.mrb[5].mxu1 }
 0x559   :  { %v1003_v32 = vcombine.low %v996_v2, %v998_v5  ;;  %1150 = vmatprep.mubr.f32.mxu0 %v998_v5 }
 0x55a   :  { %1151 = vmatmul.mubr.f32.vlgmr.msra.gmra.mrb[6].mxu0 %v996_v2 }
 0x55b   :  { %v1010_v33 = vrot.slane %v1003_v32, %v2029_v16 }
 0x55d   :  { %v1017_v39 = vrot.slane %v1010_v33, %v2029_v16 }
 0x55f   :  { %1020 = vst.msk [vmem:[#allocation5 + $0x6] ss:$8 sm:$0x3] %vm2043_vm8, %v1017_v39 }
 0x62d   :  { %v1152_v40 = vpop.f32.mrb[6].mxu0 }
 0x62e   :  { %v1154_v47 = vpop.f32.mrb[7].mxu0 }
 0x62f   :  { %v1159_v48 = vcombine.low %v1152_v40, %v1154_v47  ;;  %1306 = vmatprep.mubr.f32.mxu1 %v1154_v47 }
 0x630   :  { %1307 = vmatmul.mubr.f32.vlgmr.msra.gmra.mrb[6].mxu1 %v1152_v40 }
 0x631   :  { %v1166_v53 = vrot.slane %v1159_v48, %v2029_v16 }
 0x633   :  { %v1173_v56 = vrot.slane %v1166_v53, %v2029_v16 }
 0x635   :  { %1176 = vst.msk [vmem:[#allocation5 + $0x7] ss:$8 sm:$0x3] %vm2043_vm8, %v1173_v56 }
 0x703   :  { %v1308_v61 = vpop.f32.mrb[6].mxu1 }
 0x704   :  { %v1310_v62 = vpop.f32.mrb[7].mxu1 }
 0x705   :  { %v1315_v7 = vcombine.low %v1308_v61, %v1310_v62 }
 0x707   :  { %v1322_v8 = vrot.slane %v1315_v7, %v2029_v16 }
 0x709   :  { %v1329_v22 = vrot.slane %v1322_v8, %v2029_v16 }
 0x70b   :  { %1332 = vst.msk [vmem:[#allocation5 + $0x10] ss:$8 sm:$0x3] %vm2043_vm8, %v1329_v22 }
 0x70c   :  { %1909 = shalt.err (!%p1906_p12)
}
 0x70d   :  { %s1910_s24 = scalar_lea.hbm %s2420_s1, 512 }
 0x70e   :  { %p1911_p13 = scmp.ne.s32.totalorder %s2420_s1, %s1910_s24  ;;  %p1914_p0 = scmp.lt.u32.totalorder %s1910_s24, %s2420_s1 }
 0x710   :  { %p1916_p1 = pnand %p1914_p0, %p1911_p13 }
 0x712   :  { %1919 = shalt.err (!%p1916_p1)
}
 0x713   :  { %1345 = dma.vmem_to_hbm [thread:$0]  %s1340_s20, 512, %s2420_s1, [#allocation4], %s1925_s16, %s1925_s16, %s1926_s17  }
 0x714   :  { %1922 = dma.done.wait [#allocation4], 512  }
 0x715   :  { %1923 = vsyncadd [#allocation4], 4294966784 }
 0x716   :  { %1349 = vsyncpa [#allocation3], 1 }
 0x717   :  { %1350 = vsyncpa [#allocation4], 1 }

</bundles_post_ra>
